<compile_context>
chip_gen: v7x
topology: tpu7x:2x2x1
jax: 0.10.0
libtpu: 0.0.40
codegen_flags: <defaults>
</compile_context>

<pallas_src>
import functools

import jax
import jax.numpy as jnp
from jax.experimental import pallas as pl
from jax.experimental.pallas import tpu as pltpu


# ------------------------------- tunables ----------------------------------- #
TM_MAX = 512      # max output-row tile (rows of the im2col matrix = N*Ho*Wo)
TN_MAX = 512      # max output-channel tile (always a multiple of 128)
TK_MAX = 512      # max reduction (K) tile
MXU_DTYPE = jnp.bfloat16    # MXU-native on v5e/v6e/v7x; accumulation is f32
SLAB_DTYPE = jnp.bfloat16   # dtype of intermediate (conv1 / shortcut) slabs
VMEM_LIMIT_BYTES = 48 * 1024 * 1024  # safe under v7x's 64 MiB physical VMEM


def _round_up(x, m):
    return (x + m - 1) // m * m


def _pick_tile(dim, max_tile):
    """Pad `dim` to a multiple of 128, then pick the largest 128-multiple tile
    that exactly divides the padded size and is <= max_tile (no MXU work or
    HBM bytes wasted on padding beyond the mandatory 128 alignment)."""
    pad = _round_up(dim, 128)
    q = pad // 128
    best = 1
    for d in range(1, min(q, max_tile // 128) + 1):
        if q % d == 0:
            best = d
    return pad, 128 * best


# ----------------------------- Pallas kernels ------------------------------- #

def _matmul_bias_act_kernel(p_ref, w_ref, bias_ref, o_ref, acc_ref, *, apply_relu):
    """Tiled conv-as-matmul: bias-seeded K-reduction accumulator (+ReLU)."""
    @pl.when(pl.program_id(2) == 0)
    def _():
        acc_ref[...] = jnp.broadcast_to(bias_ref[...], acc_ref.shape)

    acc_ref[...] += jnp.dot(p_ref[...], w_ref[...],
                            preferred_element_type=jnp.float32)

    @pl.when(pl.program_id(2) == pl.num_programs(2) - 1)
    def _():
        y = acc_ref[...]
        if apply_relu:
            y = jnp.maximum(y, 0.0)
        o_ref[...] = y.astype(o_ref.dtype)


def _matmul_bias_add_relu_kernel(p_ref, w_ref, bias_ref, sc_ref, o_ref, acc_ref):
    """Same as above, with the residual add + final ReLU fused in the epilogue."""
    @pl.when(pl.program_id(2) == 0)
    def _():
        acc_ref[...] = jnp.broadcast_to(bias_ref[...], acc_ref.shape)

    acc_ref[...] += jnp.dot(p_ref[...], w_ref[...],
                            preferred_element_type=jnp.float32)

    @pl.when(pl.program_id(2) == pl.num_programs(2) - 1)
    def _():
        y = acc_ref[...] + sc_ref[...].astype(jnp.float32)
        o_ref[...] = jnp.maximum(y, 0.0).astype(o_ref.dtype)


# ------------------------------- glue (JAX) --------------------------------- #

def _im2col_nhwc(x_nhwc, ksize, stride, padding):
    """Extract conv patches; tap ordering is (kh, kw, channel)."""
    N, H, W, C = x_nhwc.shape
    xp = jnp.pad(x_nhwc, ((0, 0), (padding, padding), (padding, padding), (0, 0)))
    Ho = (H + 2 * padding - ksize) // stride + 1
    Wo = (W + 2 * padding - ksize) // stride + 1
    cols = []
    for kh in range(ksize):
        for kw in range(ksize):
            cols.append(
                xp[:,
                   kh:kh + (Ho - 1) * stride + 1:stride,
                   kw:kw + (Wo - 1) * stride + 1:stride,
                   :])
    patches = jnp.concatenate(cols, axis=-1)  # (N, Ho, Wo, k*k*C)
    return patches.reshape(N * Ho * Wo, ksize * ksize * C), (N, Ho, Wo)


def _conv_bn_matmul(x_nhwc, w_oihw, bn_scale, bn_bias, *, stride, padding,
                    apply_relu=False, shortcut_2d=None, out_dtype=None):
    """conv2d(bias=False) + folded BN (+ReLU, or +residual-add+ReLU).

    Returns the lane-dense padded 2-D output (M_pad, N_pad) plus metadata so
    callers can reuse the slab (e.g. as a fused-epilogue shortcut) without a
    slice / re-pad HBM round-trip.  M_pad/N_pad depend only on (M, Cout), not
    the tile choice, so slabs from different convs of matching size line up.
    """
    Cout, Cin, kh, kw = w_oihw.shape
    # TODO(synk): the im2col patch matrix is still materialized in HBM (~k*k x
    # input-read inflation, now in bf16); fully fusing the tap gather into the
    # kernel needs overlapping shifted windows that Blocked BlockSpecs cannot
    # express (manual-DMA memory_space=pl.ANY path).
    patches, (N, Ho, Wo) = _im2col_nhwc(x_nhwc, kh, stride, padding)
    M, K = patches.shape

    M_pad, TM = _pick_tile(M, TM_MAX)
    N_pad, TN = _pick_tile(Cout, TN_MAX)
    K_pad, TK = _pick_tile(K, TK_MAX)

    # v7x has two TensorCores: make sure the parallel (i, j) grid has >= 2
    # blocks whenever the problem is big enough, so neither core idles.
    if M_pad // TM == 1 and N_pad // TN == 1:
        if M_pad >= 256:
            TM = M_pad // 2 if (M_pad // 2) % 128 == 0 else 128
        elif N_pad >= 256:
            TN = N_pad // 2 if (N_pad // 2) % 128 == 0 else 128

    # Fold the BN scale into the weight columns (f32), then cast to bf16.
    w2d = jnp.transpose(w_oihw, (2, 3, 1, 0)).reshape(kh * kw * Cin, Cout)
    w2d = w2d.astype(jnp.float32) * bn_scale.reshape(1, Cout).astype(jnp.float32)
    w2d = jnp.pad(w2d, ((0, K_pad - K), (0, N_pad - Cout))).astype(MXU_DTYPE)
    bias2d = jnp.pad(bn_bias.reshape(1, Cout).astype(jnp.float32),
                     ((0, 0), (0, N_pad - Cout)))
    patches = jnp.pad(patches.astype(MXU_DTYPE),
                      ((0, M_pad - M), (0, K_pad - K)))

    out_dtype = x_nhwc.dtype if out_dtype is None else out_dtype
    grid = (M_pad // TM, N_pad // TN, K_pad // TK)

    in_specs = [
        pl.BlockSpec((TM, TK), lambda i, j, k: (i, k)),   # patches
        pl.BlockSpec((TK, TN), lambda i, j, k: (k, j)),   # BN-scaled weights
        pl.BlockSpec((1, TN), lambda i, j, k: (0, j)),    # bias (seeds acc)
    ]
    inputs = [patches, w2d, bias2d]
    if shortcut_2d is not None:
        # Block index is k-invariant, so the pipeline skips re-fetching it.
        in_specs.append(pl.BlockSpec((TM, TN), lambda i, j, k: (i, j)))
        inputs.append(shortcut_2d)
        kernel = _matmul_bias_add_relu_kernel
    else:
        kernel = functools.partial(_matmul_bias_act_kernel, apply_relu=apply_relu)

    bytes_accessed = (
        patches.size * patches.dtype.itemsize * (N_pad // TN)   # re-streamed per j
        + w2d.size * w2d.dtype.itemsize * (M_pad // TM)         # re-streamed per i
        + bias2d.size * bias2d.dtype.itemsize
        + M_pad * N_pad * jnp.dtype(out_dtype).itemsize
        + (shortcut_2d.size * shortcut_2d.dtype.itemsize
           if shortcut_2d is not None else 0))

    out2d = pl.pallas_call(
        kernel,
        out_shape=jax.ShapeDtypeStruct((M_pad, N_pad), out_dtype),
        grid_spec=pltpu.PrefetchScalarGridSpec(
            num_scalar_prefetch=0,
            grid=grid,
            in_specs=in_specs,
            out_specs=pl.BlockSpec((TM, TN), lambda i, j, k: (i, j)),
            scratch_shapes=[pltpu.VMEM((TM, TN), jnp.float32)],
        ),
        compiler_params=pltpu.CompilerParams(
            dimension_semantics=("parallel", "parallel", "arbitrary"),
            vmem_limit_bytes=VMEM_LIMIT_BYTES,
        ),
        cost_estimate=pl.CostEstimate(
            flops=2 * M_pad * N_pad * K_pad,
            transcendentals=0,
            bytes_accessed=int(bytes_accessed),
        ),
    )(*inputs)
    return out2d, (N, Ho, Wo, Cout, M, M_pad, N_pad)


def _fold_bn(gamma, beta, running_mean, running_var, eps=1e-5):
    scale = gamma * jax.lax.rsqrt(running_var + eps)
    bias = beta - running_mean * scale
    return scale, bias


def basic_block_forward(x_nchw, params, stride):
    """Forward of ResNet BasicBlock (expansion=1), inference BN."""
    # NOTE: for a stack of BasicBlocks keep activations NHWC (and bf16) across
    # blocks and do the NCHW<->NHWC transposes once per network; this wrapper
    # matches the single PyTorch module's NCHW interface.
    x = jnp.transpose(x_nchw, (0, 2, 3, 1)).astype(MXU_DTYPE)  # NCHW -> NHWC
    N, H, W, Cin = x.shape

    s1, b1 = _fold_bn(*params["bn1"])
    s2, b2 = _fold_bn(*params["bn2"])

    # conv1 (3x3, stride) + BN + ReLU -> bf16 slab
    r1_2d, (_, Ho, Wo, C1, M1, M1_pad, N1_pad) = _conv_bn_matmul(
        x, params["conv1_w"], s1, b1, stride=stride, padding=1,
        apply_relu=True, out_dtype=SLAB_DTYPE)
    r1 = r1_2d[:M1, :C1].reshape(N, Ho, Wo, C1)

    # shortcut (identity, or 1x1 conv(stride) + BN), kept as the lane-dense
    # bf16 (M_pad, N_pad) slab so it fuses straight into conv2's epilogue.
    if "conv_sc_w" in params:
        ss, bs = _fold_bn(*params["bn_sc"])
        sc_2d, _ = _conv_bn_matmul(x, params["conv_sc_w"], ss, bs,
                                   stride=stride, padding=0,
                                   apply_relu=False, out_dtype=SLAB_DTYPE)
    else:
        # Identity shortcut is only constructed by the PyTorch module when
        # stride == 1 and in_channels == out_channels.
        assert stride == 1 and Cin == C1, "identity shortcut needs stride=1, Cin==Cout"
        sc_2d = jnp.pad(x.reshape(N * H * W, Cin).astype(SLAB_DTYPE),
                        ((0, M1_pad - M1), (0, N1_pad - Cin)))

    # conv2 (3x3, stride 1) + BN, residual add + final ReLU fused in epilogue.
    # `.detach()` in the reference only affects autograd, not forward values.
    out_2d, (_, Ho2, Wo2, C2, M2, _, _) = _conv_bn_matmul(
        r1, params["conv2_w"], s2, b2, stride=1, padding=1,
        shortcut_2d=sc_2d, out_dtype=x_nchw.dtype)
    out = out_2d[:M2, :C2].reshape(N, Ho2, Wo2, C2)
    return jnp.transpose(out, (0, 3, 1, 2))  # NHWC -> NCHW


# --------------------------------- main -------------------------------------- #

def _make_bn_params(key, c):
    k1, k2, k3, k4 = jax.random.split(key, 4)
    gamma = 1.0 + 0.1 * jax.random.normal(k1, (c,), jnp.float32)
    beta = 0.1 * jax.random.normal(k2, (c,), jnp.float32)
    running_mean = 0.1 * jax.random.normal(k3, (c,), jnp.float32)
    running_var = 1.0 + 0.1 * jax.random.uniform(k4, (c,), jnp.float32)
    return (gamma, beta, running_mean, running_var)


if __name__ == "__main__":
    key = jax.random.PRNGKey(0)
    N, Cin, H, W = 2, 4, 16, 16
    Cout, stride = 8, 2  # in_channels != out_channels (and stride != 1) -> conv shortcut

    ks = jax.random.split(key, 8)
    params = {
        "conv1_w": 0.1 * jax.random.normal(ks[0], (Cout, Cin, 3, 3), jnp.float32),
        "bn1": _make_bn_params(ks[1], Cout),
        "conv2_w": 0.1 * jax.random.normal(ks[2], (Cout, Cout, 3, 3), jnp.float32),
        "bn2": _make_bn_params(ks[3], Cout),
        "conv_sc_w": 0.1 * jax.random.normal(ks[4], (Cout, Cin, 1, 1), jnp.float32),
        "bn_sc": _make_bn_params(ks[5], Cout),
    }
    x = jax.random.normal(ks[6], (N, Cin, H, W), jnp.float32)

    fwd = jax.jit(functools.partial(basic_block_forward, stride=stride))
    y = jax.block_until_ready(fwd(x, params))
    assert y.shape == (N, Cout, H // stride, W // stride), y.shape
    assert y.dtype == x.dtype, y.dtype
    assert bool(jnp.all(y >= 0.0))  # final ReLU
    print("KERNEL_OK")
</pallas_src>

<mosaic_0001>
module attributes {stable_mosaic.version = 11 : i64} {
  func.func @_matmul_bias_act_kernel(%arg0: i32, %arg1: i32, %arg2: i32, %arg3: memref<128x128xbf16, #tpu.memory_space<vmem>>, %arg4: memref<128x128xbf16, #tpu.memory_space<vmem>>, %arg5: memref<1x128xf32, #tpu.memory_space<vmem>>, %arg6: memref<128x128xbf16, #tpu.memory_space<vmem>>, %arg7: memref<128x128xf32, #tpu.memory_space<vmem>>) attributes {dimension_semantics = [#tpu.dimension_semantics<parallel>, #tpu.dimension_semantics<parallel>, #tpu.dimension_semantics<arbitrary>], iteration_bounds = array<i64: 1, 1, 1>, scalar_prefetch = 0 : i64, scratch_operands = 1 : i64, tpu.core_type = #tpu.core_type<tc>, window_params = [{transform_indices = @transform_0, window_bounds = array<i64: 128, 128>}, {transform_indices = @transform_1, window_bounds = array<i64: 128, 128>}, {transform_indices = @transform_2, window_bounds = array<i64: 1, 128>}, {transform_indices = @transform_3, window_bounds = array<i64: 128, 128>}]} {
    %c0_i32 = arith.constant 0 : i32
    %0 = arith.cmpi eq, %arg2, %c0_i32 : i32
    %1 = arith.extui %0 : i1 to i32
    %c0_i32_0 = arith.constant 0 : i32
    %2 = arith.cmpi ne, %1, %c0_i32_0 : i32
    scf.if %2 {
      %c0_10 = arith.constant 0 : index
      %c0_11 = arith.constant 0 : index
      %12 = vector.load %arg5[%c0_10, %c0_11] : memref<1x128xf32, #tpu.memory_space<vmem>>, vector<1x128xf32>
      %13 = vector.shape_cast %12 : vector<1x128xf32> to vector<1x128xf32>
      %14 = vector.broadcast %13 : vector<1x128xf32> to vector<128x128xf32>
      %c0_12 = arith.constant 0 : index
      %c0_13 = arith.constant 0 : index
      %15 = vector.load %arg7[%c0_12, %c0_13] : memref<128x128xf32, #tpu.memory_space<vmem>>, vector<128x128xf32>
      tpu.vector_store %arg7[%c0_12, %c0_13], %14 {strides = array<i32>} : memref<128x128xf32, #tpu.memory_space<vmem>>, vector<128x128xf32>,
    } else {
    }
    %c0 = arith.constant 0 : index
    %c0_1 = arith.constant 0 : index
    %3 = vector.load %arg7[%c0, %c0_1] : memref<128x128xf32, #tpu.memory_space<vmem>>, vector<128x128xf32>
    %c0_2 = arith.constant 0 : index
    %c0_3 = arith.constant 0 : index
    %4 = vector.load %arg3[%c0_2, %c0_3] : memref<128x128xbf16, #tpu.memory_space<vmem>>, vector<128x128xbf16>
    %c0_4 = arith.constant 0 : index
    %c0_5 = arith.constant 0 : index
    %5 = vector.load %arg4[%c0_4, %c0_5] : memref<128x128xbf16, #tpu.memory_space<vmem>>, vector<128x128xbf16>
    %cst = arith.constant dense<0.000000e+00> : vector<128x128xf32>
    %6 = tpu.matmul %4, %5, %cst {dimension_numbers = #tpu.dot_dimension_numbers<[1], [0], [0], [1], [0, 0, 1, 1], [], []>} : vector<128x128xbf16>, vector<128x128xbf16>, vector<128x128xf32> -> vector<128x128xf32>
    %7 = arith.addf %3, %6 : vector<128x128xf32>
    %c0_6 = arith.constant 0 : index
    %c0_7 = arith.constant 0 : index
    %8 = vector.load %arg7[%c0_6, %c0_7] : memref<128x128xf32, #tpu.memory_space<vmem>>, vector<128x128xf32>
    tpu.vector_store %arg7[%c0_6, %c0_7], %7 {strides = array<i32>} : memref<128x128xf32, #tpu.memory_space<vmem>>, vector<128x128xf32>,
    %c0_i32_8 = arith.constant 0 : i32
    %9 = arith.cmpi eq, %arg2, %c0_i32_8 : i32
    %10 = arith.extui %9 : i1 to i32
    %c0_i32_9 = arith.constant 0 : i32
    %11 = arith.cmpi ne, %10, %c0_i32_9 : i32
    scf.if %11 {
      %c0_10 = arith.constant 0 : index
      %c0_11 = arith.constant 0 : index
      %12 = vector.load %arg7[%c0_10, %c0_11] : memref<128x128xf32, #tpu.memory_space<vmem>>, vector<128x128xf32>
      %cst_12 = arith.constant 0.000000e+00 : f32
      %13 = vector.broadcast %cst_12 : f32 to vector<128x128xf32>
      %14 = arith.maximumf %12, %13 : vector<128x128xf32>
      %15 = arith.truncf %14 : vector<128x128xf32> to vector<128x128xbf16>
      %c0_13 = arith.constant 0 : index
      %c0_14 = arith.constant 0 : index
      %16 = vector.load %arg6[%c0_13, %c0_14] : memref<128x128xbf16, #tpu.memory_space<vmem>>, vector<128x128xbf16>
      tpu.vector_store %arg6[%c0_13, %c0_14], %15 {strides = array<i32>} : memref<128x128xbf16, #tpu.memory_space<vmem>>, vector<128x128xbf16>,
    } else {
    }
    return
  }
  func.func @transform_0(%arg0: i32, %arg1: i32, %arg2: i32) -> (i32, i32) {
    %c0_i32 = arith.constant 0 : i32
    return %arg0, %arg2 : i32, i32
  }
  func.func @transform_1(%arg0: i32, %arg1: i32, %arg2: i32) -> (i32, i32) {
    %c0_i32 = arith.constant 0 : i32
    return %arg2, %arg1 : i32, i32
  }
  func.func @transform_2(%arg0: i32, %arg1: i32, %arg2: i32) -> (i32, i32) {
    %c0_i32 = arith.constant 0 : i32
    %c0_i32_0 = arith.constant 0 : i32
    return %c0_i32, %arg1 : i32, i32
  }
  func.func @transform_3(%arg0: i32, %arg1: i32, %arg2: i32) -> (i32, i32) {
    %c0_i32 = arith.constant 0 : i32
    return %arg0, %arg1 : i32, i32
  }
}

module attributes {stable_mosaic.version = 11 : i64} {
  func.func @_matmul_bias_act_kernel(%arg0: i32, %arg1: i32, %arg2: i32, %arg3: memref<128x128xbf16, #tpu.memory_space<vmem>>, %arg4: memref<128x128xbf16, #tpu.memory_space<vmem>>, %arg5: memref<1x128xf32, #tpu.memory_space<vmem>>, %arg6: memref<128x128xbf16, #tpu.memory_space<vmem>>, %arg7: memref<128x128xf32, #tpu.memory_space<vmem>>) attributes {dimension_semantics = [#tpu.dimension_semantics<parallel>, #tpu.dimension_semantics<parallel>, #tpu.dimension_semantics<arbitrary>], iteration_bounds = array<i64: 1, 1, 1>, scalar_prefetch = 0 : i64, scratch_operands = 1 : i64, tpu.core_type = #tpu.core_type<tc>, window_params = [{transform_indices = @transform_0, window_bounds = array<i64: 128, 128>}, {transform_indices = @transform_1, window_bounds = array<i64: 128, 128>}, {transform_indices = @transform_2, window_bounds = array<i64: 1, 128>}, {transform_indices = @transform_3, window_bounds = array<i64: 128, 128>}]} {
    %c0_i32 = arith.constant 0 : i32
    %0 = arith.cmpi eq, %arg2, %c0_i32 : i32
    %1 = arith.extui %0 : i1 to i32
    %c0_i32_0 = arith.constant 0 : i32
    %2 = arith.cmpi ne, %1, %c0_i32_0 : i32
    scf.if %2 {
      %c0_10 = arith.constant 0 : index
      %c0_11 = arith.constant 0 : index
      %12 = vector.load %arg5[%c0_10, %c0_11] : memref<1x128xf32, #tpu.memory_space<vmem>>, vector<1x128xf32>
      %13 = vector.shape_cast %12 : vector<1x128xf32> to vector<1x128xf32>
      %14 = vector.broadcast %13 : vector<1x128xf32> to vector<128x128xf32>
      %c0_12 = arith.constant 0 : index
      %c0_13 = arith.constant 0 : index
      %15 = vector.load %arg7[%c0_12, %c0_13] : memref<128x128xf32, #tpu.memory_space<vmem>>, vector<128x128xf32>
      tpu.vector_store %arg7[%c0_12, %c0_13], %14 {strides = array<i32>} : memref<128x128xf32, #tpu.memory_space<vmem>>, vector<128x128xf32>,
    } else {
    }
    %c0 = arith.constant 0 : index
    %c0_1 = arith.constant 0 : index
    %3 = vector.load %arg7[%c0, %c0_1] : memref<128x128xf32, #tpu.memory_space<vmem>>, vector<128x128xf32>
    %c0_2 = arith.constant 0 : index
    %c0_3 = arith.constant 0 : index
    %4 = vector.load %arg3[%c0_2, %c0_3] : memref<128x128xbf16, #tpu.memory_space<vmem>>, vector<128x128xbf16>
    %c0_4 = arith.constant 0 : index
    %c0_5 = arith.constant 0 : index
    %5 = vector.load %arg4[%c0_4, %c0_5] : memref<128x128xbf16, #tpu.memory_space<vmem>>, vector<128x128xbf16>
    %cst = arith.constant dense<0.000000e+00> : vector<128x128xf32>
    %6 = tpu.matmul %4, %5, %cst {dimension_numbers = #tpu.dot_dimension_numbers<[1], [0], [0], [1], [0, 0, 1, 1], [], []>} : vector<128x128xbf16>, vector<128x128xbf16>, vector<128x128xf32> -> vector<128x128xf32>
    %7 = arith.addf %3, %6 : vector<128x128xf32>
    %c0_6 = arith.constant 0 : index
    %c0_7 = arith.constant 0 : index
    %8 = vector.load %arg7[%c0_6, %c0_7] : memref<128x128xf32, #tpu.memory_space<vmem>>, vector<128x128xf32>
    tpu.vector_store %arg7[%c0_6, %c0_7], %7 {strides = array<i32>} : memref<128x128xf32, #tpu.memory_space<vmem>>, vector<128x128xf32>,
    %c0_i32_8 = arith.constant 0 : i32
    %9 = arith.cmpi eq, %arg2, %c0_i32_8 : i32
    %10 = arith.extui %9 : i1 to i32
    %c0_i32_9 = arith.constant 0 : i32
    %11 = arith.cmpi ne, %10, %c0_i32_9 : i32
    scf.if %11 {
      %c0_10 = arith.constant 0 : index
      %c0_11 = arith.constant 0 : index
      %12 = vector.load %arg7[%c0_10, %c0_11] : memref<128x128xf32, #tpu.memory_space<vmem>>, vector<128x128xf32>
      %13 = arith.truncf %12 : vector<128x128xf32> to vector<128x128xbf16>
      %c0_12 = arith.constant 0 : index
      %c0_13 = arith.constant 0 : index
      %14 = vector.load %arg6[%c0_12, %c0_13] : memref<128x128xbf16, #tpu.memory_space<vmem>>, vector<128x128xbf16>
      tpu.vector_store %arg6[%c0_12, %c0_13], %13 {strides = array<i32>} : memref<128x128xbf16, #tpu.memory_space<vmem>>, vector<128x128xbf16>,
    } else {
    }
    return
  }
  func.func @transform_0(%arg0: i32, %arg1: i32, %arg2: i32) -> (i32, i32) {
    %c0_i32 = arith.constant 0 : i32
    return %arg0, %arg2 : i32, i32
  }
  func.func @transform_1(%arg0: i32, %arg1: i32, %arg2: i32) -> (i32, i32) {
    %c0_i32 = arith.constant 0 : i32
    return %arg2, %arg1 : i32, i32
  }
  func.func @transform_2(%arg0: i32, %arg1: i32, %arg2: i32) -> (i32, i32) {
    %c0_i32 = arith.constant 0 : i32
    %c0_i32_0 = arith.constant 0 : i32
    return %c0_i32, %arg1 : i32, i32
  }
  func.func @transform_3(%arg0: i32, %arg1: i32, %arg2: i32) -> (i32, i32) {
    %c0_i32 = arith.constant 0 : i32
    return %arg0, %arg1 : i32, i32
  }
}

module attributes {stable_mosaic.version = 11 : i64} {
  func.func @_matmul_bias_add_relu_kernel(%arg0: i32, %arg1: i32, %arg2: i32, %arg3: memref<128x128xbf16, #tpu.memory_space<vmem>>, %arg4: memref<128x128xbf16, #tpu.memory_space<vmem>>, %arg5: memref<1x128xf32, #tpu.memory_space<vmem>>, %arg6: memref<128x128xbf16, #tpu.memory_space<vmem>>, %arg7: memref<128x128xf32, #tpu.memory_space<vmem>>, %arg8: memref<128x128xf32, #tpu.memory_space<vmem>>) attributes {dimension_semantics = [#tpu.dimension_semantics<parallel>, #tpu.dimension_semantics<parallel>, #tpu.dimension_semantics<arbitrary>], iteration_bounds = array<i64: 1, 1, 1>, scalar_prefetch = 0 : i64, scratch_operands = 1 : i64, tpu.core_type = #tpu.core_type<tc>, window_params = [{transform_indices = @transform_0, window_bounds = array<i64: 128, 128>}, {transform_indices = @transform_1, window_bounds = array<i64: 128, 128>}, {transform_indices = @transform_2, window_bounds = array<i64: 1, 128>}, {transform_indices = @transform_3, window_bounds = array<i64: 128, 128>}, {transform_indices = @transform_4, window_bounds = array<i64: 128, 128>}]} {
    %c0_i32 = arith.constant 0 : i32
    %0 = arith.cmpi eq, %arg2, %c0_i32 : i32
    %1 = arith.extui %0 : i1 to i32
    %c0_i32_0 = arith.constant 0 : i32
    %2 = arith.cmpi ne, %1, %c0_i32_0 : i32
    scf.if %2 {
      %c0_10 = arith.constant 0 : index
      %c0_11 = arith.constant 0 : index
      %12 = vector.load %arg5[%c0_10, %c0_11] : memref<1x128xf32, #tpu.memory_space<vmem>>, vector<1x128xf32>
      %13 = vector.shape_cast %12 : vector<1x128xf32> to vector<1x128xf32>
      %14 = vector.broadcast %13 : vector<1x128xf32> to vector<128x128xf32>
      %c0_12 = arith.constant 0 : index
      %c0_13 = arith.constant 0 : index
      %15 = vector.load %arg8[%c0_12, %c0_13] : memref<128x128xf32, #tpu.memory_space<vmem>>, vector<128x128xf32>
      tpu.vector_store %arg8[%c0_12, %c0_13], %14 {strides = array<i32>} : memref<128x128xf32, #tpu.memory_space<vmem>>, vector<128x128xf32>,
    } else {
    }
    %c0 = arith.constant 0 : index
    %c0_1 = arith.constant 0 : index
    %3 = vector.load %arg8[%c0, %c0_1] : memref<128x128xf32, #tpu.memory_space<vmem>>, vector<128x128xf32>
    %c0_2 = arith.constant 0 : index
    %c0_3 = arith.constant 0 : index
    %4 = vector.load %arg3[%c0_2, %c0_3] : memref<128x128xbf16, #tpu.memory_space<vmem>>, vector<128x128xbf16>
    %c0_4 = arith.constant 0 : index
    %c0_5 = arith.constant 0 : index
    %5 = vector.load %arg4[%c0_4, %c0_5] : memref<128x128xbf16, #tpu.memory_space<vmem>>, vector<128x128xbf16>
    %cst = arith.constant dense<0.000000e+00> : vector<128x128xf32>
    %6 = tpu.matmul %4, %5, %cst {dimension_numbers = #tpu.dot_dimension_numbers<[1], [0], [0], [1], [0, 0, 1, 1], [], []>} : vector<128x128xbf16>, vector<128x128xbf16>, vector<128x128xf32> -> vector<128x128xf32>
    %7 = arith.addf %3, %6 : vector<128x128xf32>
    %c0_6 = arith.constant 0 : index
    %c0_7 = arith.constant 0 : index
    %8 = vector.load %arg8[%c0_6, %c0_7] : memref<128x128xf32, #tpu.memory_space<vmem>>, vector<128x128xf32>
    tpu.vector_store %arg8[%c0_6, %c0_7], %7 {strides = array<i32>} : memref<128x128xf32, #tpu.memory_space<vmem>>, vector<128x128xf32>,
    %c0_i32_8 = arith.constant 0 : i32
    %9 = arith.cmpi eq, %arg2, %c0_i32_8 : i32
    %10 = arith.extui %9 : i1 to i32
    %c0_i32_9 = arith.constant 0 : i32
    %11 = arith.cmpi ne, %10, %c0_i32_9 : i32
    scf.if %11 {
      %c0_10 = arith.constant 0 : index
      %c0_11 = arith.constant 0 : index
      %12 = vector.load %arg8[%c0_10, %c0_11] : memref<128x128xf32, #tpu.memory_space<vmem>>, vector<128x128xf32>
      %c0_12 = arith.constant 0 : index
      %c0_13 = arith.constant 0 : index
      %13 = vector.load %arg6[%c0_12, %c0_13] : memref<128x128xbf16, #tpu.memory_space<vmem>>, vector<128x128xbf16>
      %14 = arith.extf %13 : vector<128x128xbf16> to vector<128x128xf32>
      %15 = arith.addf %12, %14 : vector<128x128xf32>
      %cst_14 = arith.constant 0.000000e+00 : f32
      %16 = vector.broadcast %cst_14 : f32 to vector<128x128xf32>
      %17 = arith.maximumf %15, %16 : vector<128x128xf32>
      %c0_15 = arith.constant 0 : index
      %c0_16 = arith.constant 0 : index
      %18 = vector.load %arg7[%c0_15, %c0_16] : memref<128x128xf32, #tpu.memory_space<vmem>>, vector<128x128xf32>
      tpu.vector_store %arg7[%c0_15, %c0_16], %17 {strides = array<i32>} : memref<128x128xf32, #tpu.memory_space<vmem>>, vector<128x128xf32>,
    } else {
    }
    return
  }
  func.func @transform_0(%arg0: i32, %arg1: i32, %arg2: i32) -> (i32, i32) {
    %c0_i32 = arith.constant 0 : i32
    return %arg0, %arg2 : i32, i32
  }
  func.func @transform_1(%arg0: i32, %arg1: i32, %arg2: i32) -> (i32, i32) {
    %c0_i32 = arith.constant 0 : i32
    return %arg2, %arg1 : i32, i32
  }
  func.func @transform_2(%arg0: i32, %arg1: i32, %arg2: i32) -> (i32, i32) {
    %c0_i32 = arith.constant 0 : i32
    %c0_i32_0 = arith.constant 0 : i32
    return %c0_i32, %arg1 : i32, i32
  }
  func.func @transform_3(%arg0: i32, %arg1: i32, %arg2: i32) -> (i32, i32) {
    %c0_i32 = arith.constant 0 : i32
    return %arg0, %arg1 : i32, i32
  }
  func.func @transform_4(%arg0: i32, %arg1: i32, %arg2: i32) -> (i32, i32) {
    %c0_i32 = arith.constant 0 : i32
    return %arg0, %arg1 : i32, i32
  }
}

</mosaic_0001>

<bundles_post_ra>
// kernel: basic_block_forward.3
= control target key start
LH: loop header
LB: loop body
LE: loop exit
PB: predicated region body
PF: predicated region fallthrough
CT: control target
= control target key end

     0   :  { %s705_s1 = inlined_call_operand.vmem [shape: bf16[128,128], index: 1, kind: input, shape index: {}]   ;;  %s706_s0 = inlined_call_operand.vmem [shape: bf16[128,128], index: 0, kind: input, shape index: {}]   ;;  %s707_s2 = inlined_call_operand.vmem [shape: f32[1,128], index: 2, kind: input, shape index: {}]   ;;  %s708_s3 = inlined_call_operand.vmem [shape: bf16[128,128], index: 3, kind: output, shape index: {}]  }
   0x1   :  { %v594_v0 = vld [vmem:[%s705_s1] sm:$0xff]   ;;  %v595_v1 = vld [vmem:[%s705_s1 + $0x8] sm:$0xff]   ;;  %v596_v2 = vld [vmem:[%s705_s1 + $0x10] sm:$0xff]  }
   0x2   :  { %546 = vmatprep.subr.bf16.mxu0 %v594_v0  ;;  %578 = vmatprep.subr.bf16.mxu1 %v594_v0  ;;  %v597_v3 = vld [vmem:[%s705_s1 + $0x18] sm:$0xff]   ;;  %v602_v4 = vld [vmem:[%s706_s0] sm:$0xff]   ;;  %v599_v7 = vld [vmem:[%s705_s1 + $0x28] sm:$0xff]  }
   0x3   :  { %547 = vmatpush3.bf16.msra.mxu0 %v594_v0  ;;  %586 = vmatpush3.bf16.msra.mxu1 %v594_v0  ;;  %v603_v5 = vld [vmem:[%s706_s0 + $0x20] sm:$0xff]   ;;  %v600_v8 = vld [vmem:[%s705_s1 + $0x30] sm:$0xff]   ;;  %v601_v9 = vld [vmem:[%s705_s1 + $0x38] sm:$0xff]  }
   0x4   :  { %548 = vmatprep.subr.bf16.mxu0 %v595_v1  ;;  %579 = vmatprep.subr.bf16.mxu1 %v595_v1  ;;  %v598_v6 = vld [vmem:[%s705_s1 + $0x20] sm:$0xff]   ;;  %v604_v10 = vld [vmem:[%s706_s0 + $0x8] sm:$0xff]   ;;  %v606_v12 = vld [vmem:[%s706_s0 + $0x10] sm:$0xff]  }
   0x5   :  { %562 = vmatprep.mubr.bf16.mxu0 %v602_v4  ;;  %570 = vmatprep.mubr.bf16.mxu1 %v603_v5  ;;  %v605_v11 = vld [vmem:[%s706_s0 + $0x28] sm:$0xff]   ;;  %v607_v13 = vld [vmem:[%s706_s0 + $0x30] sm:$0xff]   ;;  %v608_v14 = vld [vmem:[%s706_s0 + $0x18] sm:$0xff]  }
   0x6   :  { %v609_v15 = vld [vmem:[%s706_s0 + $0x38] sm:$0xff]   ;;  %v434_v16 = vld [vmem:[%s707_s2] ss:$0 sm:$0xff] }
   0x7   :  { %549 = vmatpush3.bf16.msra.mxu0 %v595_v1  ;;  %587 = vmatpush3.bf16.msra.mxu1 %v595_v1 }
   0x8   :  { %550 = vmatprep.subr.bf16.mxu0 %v596_v2  ;;  %580 = vmatprep.subr.bf16.mxu1 %v596_v2 }
   0xb   :  { %551 = vmatpush3.bf16.msra.mxu0 %v596_v2  ;;  %588 = vmatpush3.bf16.msra.mxu1 %v596_v2 }
   0xc   :  { %552 = vmatprep.subr.bf16.mxu0 %v597_v3  ;;  %581 = vmatprep.subr.bf16.mxu1 %v597_v3 }
   0xf   :  { %553 = vmatpush3.bf16.msra.mxu0 %v597_v3  ;;  %589 = vmatpush3.bf16.msra.mxu1 %v597_v3 }
  0x10   :  { %554 = vmatprep.subr.bf16.mxu0 %v598_v6  ;;  %582 = vmatprep.subr.bf16.mxu1 %v598_v6 }
  0x13   :  { %555 = vmatpush3.bf16.msra.mxu0 %v598_v6  ;;  %590 = vmatpush3.bf16.msra.mxu1 %v598_v6 }
  0x14   :  { %556 = vmatprep.subr.bf16.mxu0 %v599_v7  ;;  %583 = vmatprep.subr.bf16.mxu1 %v599_v7 }
  0x17   :  { %557 = vmatpush3.bf16.msra.mxu0 %v599_v7  ;;  %591 = vmatpush3.bf16.msra.mxu1 %v599_v7 }
  0x18   :  { %558 = vmatprep.subr.bf16.mxu0 %v600_v8  ;;  %584 = vmatprep.subr.bf16.mxu1 %v600_v8 }
  0x1b   :  { %559 = vmatpush3.bf16.msra.mxu0 %v600_v8  ;;  %592 = vmatpush3.bf16.msra.mxu1 %v600_v8 }
  0x1c   :  { %560 = vmatprep.subr.bf16.mxu0 %v601_v9  ;;  %585 = vmatprep.subr.bf16.mxu1 %v601_v9 }
  0x1f   :  { %561 = vmatpush3.bf16.msra.mxu0 %v601_v9  ;;  %593 = vmatpush3.bf16.msra.mxu1 %v601_v9 }
  0x22   :  { %563 = vmatmul.mubr.bf16.vlgmr.msra.gmra.mrb[0].mxu0 %v604_v10  ;;  %571 = vmatmul.mubr.bf16.vlgmr.msra.gmra.mrb[0].mxu1 %v605_v11 }
  0x23   :  { %566 = vmatprep.mubr.bf16.mxu0 %v606_v12  ;;  %574 = vmatprep.mubr.bf16.mxu1 %v607_v13 }
  0x2a   :  { %567 = vmatmul.mubr.bf16.gmra.mrb[4].mxu0 %v608_v14  ;;  %575 = vmatmul.mubr.bf16.gmra.mrb[4].mxu1 %v609_v15 }
  0xf5   :  { %v564_v17 = vpop.f32.mrb[0].mxu0  ;;  %v572_v18 = vpop.f32.mrb[0].mxu1 }
  0xf6   :  { %v285_v19 = vadd.f32 %v564_v17, %v434_v16  ;;  %v293_v20 = vadd.f32 %v572_v18, %v434_v16  ;;  %v220_v21 = vpop.f32.mrb[1].mxu0  ;;  %v252_v22 = vpop.f32.mrb[1].mxu1 }
  0xf7   :  { %v283_v23 = vadd.f32 %v434_v16, %v220_v21  ;;  %v291_v24 = vadd.f32 %v434_v16, %v252_v22  ;;  %v565_v25 = vpop.f32.mrb[2].mxu0  ;;  %v573_v26 = vpop.f32.mrb[2].mxu1 }
  0xf8   :  { %v286_v27 = vadd.f32 %v565_v25, %v434_v16  ;;  %v294_v28 = vadd.f32 %v573_v26, %v434_v16  ;;  %v223_v29 = vpop.f32.mrb[3].mxu0  ;;  %v255_v30 = vpop.f32.mrb[3].mxu1  ;;  %v336_v33 = vmax.f32 %v285_v19, 0.0  ;;  %v344_v34 = vmax.f32 %v293_v20, 0.0 }
  0xf9   :  { %v284_v31 = vadd.f32 %v434_v16, %v223_v29  ;;  %v292_v32 = vadd.f32 %v434_v16, %v255_v30  ;;  %v334_v37 = vmax.f32 %v283_v23, 0.0  ;;  %v342_v38 = vmax.f32 %v291_v24, 0.0 }
  0xfa   :  { %v337_v35 = vmax.f32 %v286_v27, 0.0  ;;  %v345_v36 = vmax.f32 %v294_v28, 0.0 }
  0xfb   :  { %v335_v39 = vmax.f32 %v284_v31, 0.0  ;;  %v343_v40 = vmax.f32 %v292_v32, 0.0 }
  0xfc   :  { %v491_v41 = vpack.c.bf16 %v337_v35, %v336_v33  ;;  %v511_v42 = vpack.c.bf16 %v345_v36, %v344_v34 }
  0xfd   :  { %v486_v43 = vpack.c.bf16 %v335_v39, %v334_v37  ;;  %v506_v44 = vpack.c.bf16 %v343_v40, %v342_v38  ;;  %v568_v45 = vpop.f32.mrb[4].mxu0  ;;  %v576_v46 = vpop.f32.mrb[4].mxu1 }
  0xfe   :  { %523 = vst [vmem:[%s708_s3 + $0x8] sm:$0xff] %v491_v41   ;;  %527 = vst [vmem:[%s708_s3 + $0x28] sm:$0xff] %v511_v42   ;;  %v289_v47 = vadd.f32 %v568_v45, %v434_v16  ;;  %v297_v48 = vadd.f32 %v576_v46, %v434_v16  ;;  %v236_v49 = vpop.f32.mrb[5].mxu0  ;;  %v268_v50 = vpop.f32.mrb[5].mxu1 }
  0xff   :  { %487 = vst [vmem:[%s708_s3] sm:$0xff] %v486_v43   ;;  %526 = vst [vmem:[%s708_s3 + $0x20] sm:$0xff] %v506_v44   ;;  %v287_v51 = vadd.f32 %v434_v16, %v236_v49  ;;  %v295_v52 = vadd.f32 %v434_v16, %v268_v50  ;;  %v569_v53 = vpop.f32.mrb[6].mxu0  ;;  %v577_v54 = vpop.f32.mrb[6].mxu1 }
 0x100   :  { %v290_v55 = vadd.f32 %v569_v53, %v434_v16  ;;  %v298_v56 = vadd.f32 %v577_v54, %v434_v16  ;;  %v239_v57 = vpop.f32.mrb[7].mxu0  ;;  %v271_v58 = vpop.f32.mrb[7].mxu1  ;;  %v340_v61 = vmax.f32 %v289_v47, 0.0  ;;  %v348_v62 = vmax.f32 %v297_v48, 0.0 }
 0x101   :  { %v288_v59 = vadd.f32 %v434_v16, %v239_v57  ;;  %v296_v60 = vadd.f32 %v434_v16, %v271_v58  ;;  %v338_v1 = vmax.f32 %v287_v51, 0.0  ;;  %v346_v2 = vmax.f32 %v295_v52, 0.0 }
 0x102   :  { %v341_v63 = vmax.f32 %v290_v55, 0.0  ;;  %v349_v0 = vmax.f32 %v298_v56, 0.0 }
 0x103   :  { %v339_v3 = vmax.f32 %v288_v59, 0.0  ;;  %v347_v4 = vmax.f32 %v296_v60, 0.0 }
 0x104   :  { %v501_v5 = vpack.c.bf16 %v341_v63, %v340_v61  ;;  %v521_v6 = vpack.c.bf16 %v349_v0, %v348_v62 }
 0x105   :  { %v496_v7 = vpack.c.bf16 %v339_v3, %v338_v1  ;;  %v516_v8 = vpack.c.bf16 %v347_v4, %v346_v2 }
 0x106   :  { %525 = vst [vmem:[%s708_s3 + $0x18] sm:$0xff] %v501_v5   ;;  %529 = vst [vmem:[%s708_s3 + $0x38] sm:$0xff] %v521_v6  }
 0x107   :  { %524 = vst [vmem:[%s708_s3 + $0x10] sm:$0xff] %v496_v7   ;;  %528 = vst [vmem:[%s708_s3 + $0x30] sm:$0xff] %v516_v8  }

// kernel: basic_block_forward.4
= control target key start
LH: loop header
LB: loop body
LE: loop exit
PB: predicated region body
PF: predicated region fallthrough
CT: control target
= control target key end

     0   :  { %s689_s1 = inlined_call_operand.vmem [shape: bf16[128,128], index: 1, kind: input, shape index: {}]   ;;  %s690_s0 = inlined_call_operand.vmem [shape: bf16[128,128], index: 0, kind: input, shape index: {}]   ;;  %s691_s2 = inlined_call_operand.vmem [shape: f32[1,128], index: 2, kind: input, shape index: {}]   ;;  %s692_s3 = inlined_call_operand.vmem [shape: bf16[128,128], index: 3, kind: output, shape index: {}]  }
   0x1   :  { %v578_v0 = vld [vmem:[%s689_s1] sm:$0xff]   ;;  %v579_v1 = vld [vmem:[%s689_s1 + $0x8] sm:$0xff]   ;;  %v580_v2 = vld [vmem:[%s689_s1 + $0x10] sm:$0xff]  }
   0x2   :  { %530 = vmatprep.subr.bf16.mxu0 %v578_v0  ;;  %562 = vmatprep.subr.bf16.mxu1 %v578_v0  ;;  %v581_v3 = vld [vmem:[%s689_s1 + $0x18] sm:$0xff]   ;;  %v586_v4 = vld [vmem:[%s690_s0] sm:$0xff]   ;;  %v583_v7 = vld [vmem:[%s689_s1 + $0x28] sm:$0xff]  }
   0x3   :  { %531 = vmatpush3.bf16.msra.mxu0 %v578_v0  ;;  %570 = vmatpush3.bf16.msra.mxu1 %v578_v0  ;;  %v587_v5 = vld [vmem:[%s690_s0 + $0x20] sm:$0xff]   ;;  %v584_v8 = vld [vmem:[%s689_s1 + $0x30] sm:$0xff]   ;;  %v585_v9 = vld [vmem:[%s689_s1 + $0x38] sm:$0xff]  }
   0x4   :  { %532 = vmatprep.subr.bf16.mxu0 %v579_v1  ;;  %563 = vmatprep.subr.bf16.mxu1 %v579_v1  ;;  %v582_v6 = vld [vmem:[%s689_s1 + $0x20] sm:$0xff]   ;;  %v588_v10 = vld [vmem:[%s690_s0 + $0x8] sm:$0xff]   ;;  %v590_v12 = vld [vmem:[%s690_s0 + $0x10] sm:$0xff]  }
   0x5   :  { %546 = vmatprep.mubr.bf16.mxu0 %v586_v4  ;;  %554 = vmatprep.mubr.bf16.mxu1 %v587_v5  ;;  %v589_v11 = vld [vmem:[%s690_s0 + $0x28] sm:$0xff]   ;;  %v591_v13 = vld [vmem:[%s690_s0 + $0x30] sm:$0xff]   ;;  %v592_v14 = vld [vmem:[%s690_s0 + $0x18] sm:$0xff]  }
   0x6   :  { %v593_v15 = vld [vmem:[%s690_s0 + $0x38] sm:$0xff]   ;;  %v418_v16 = vld [vmem:[%s691_s2] ss:$0 sm:$0xff] }
   0x7   :  { %533 = vmatpush3.bf16.msra.mxu0 %v579_v1  ;;  %571 = vmatpush3.bf16.msra.mxu1 %v579_v1 }
   0x8   :  { %534 = vmatprep.subr.bf16.mxu0 %v580_v2  ;;  %564 = vmatprep.subr.bf16.mxu1 %v580_v2 }
   0xb   :  { %535 = vmatpush3.bf16.msra.mxu0 %v580_v2  ;;  %572 = vmatpush3.bf16.msra.mxu1 %v580_v2 }
   0xc   :  { %536 = vmatprep.subr.bf16.mxu0 %v581_v3  ;;  %565 = vmatprep.subr.bf16.mxu1 %v581_v3 }
   0xf   :  { %537 = vmatpush3.bf16.msra.mxu0 %v581_v3  ;;  %573 = vmatpush3.bf16.msra.mxu1 %v581_v3 }
  0x10   :  { %538 = vmatprep.subr.bf16.mxu0 %v582_v6  ;;  %566 = vmatprep.subr.bf16.mxu1 %v582_v6 }
  0x13   :  { %539 = vmatpush3.bf16.msra.mxu0 %v582_v6  ;;  %574 = vmatpush3.bf16.msra.mxu1 %v582_v6 }
  0x14   :  { %540 = vmatprep.subr.bf16.mxu0 %v583_v7  ;;  %567 = vmatprep.subr.bf16.mxu1 %v583_v7 }
  0x17   :  { %541 = vmatpush3.bf16.msra.mxu0 %v583_v7  ;;  %575 = vmatpush3.bf16.msra.mxu1 %v583_v7 }
  0x18   :  { %542 = vmatprep.subr.bf16.mxu0 %v584_v8  ;;  %568 = vmatprep.subr.bf16.mxu1 %v584_v8 }
  0x1b   :  { %543 = vmatpush3.bf16.msra.mxu0 %v584_v8  ;;  %576 = vmatpush3.bf16.msra.mxu1 %v584_v8 }
  0x1c   :  { %544 = vmatprep.subr.bf16.mxu0 %v585_v9  ;;  %569 = vmatprep.subr.bf16.mxu1 %v585_v9 }
  0x1f   :  { %545 = vmatpush3.bf16.msra.mxu0 %v585_v9  ;;  %577 = vmatpush3.bf16.msra.mxu1 %v585_v9 }
  0x22   :  { %547 = vmatmul.mubr.bf16.vlgmr.msra.gmra.mrb[0].mxu0 %v588_v10  ;;  %555 = vmatmul.mubr.bf16.vlgmr.msra.gmra.mrb[0].mxu1 %v589_v11 }
  0x23   :  { %550 = vmatprep.mubr.bf16.mxu0 %v590_v12  ;;  %558 = vmatprep.mubr.bf16.mxu1 %v591_v13 }
  0x2a   :  { %551 = vmatmul.mubr.bf16.gmra.mrb[4].mxu0 %v592_v14  ;;  %559 = vmatmul.mubr.bf16.gmra.mrb[4].mxu1 %v593_v15 }
  0xf5   :  { %v548_v17 = vpop.f32.mrb[0].mxu0  ;;  %v556_v18 = vpop.f32.mrb[0].mxu1 }
  0xf6   :  { %v220_v19 = vpop.f32.mrb[1].mxu0  ;;  %v252_v20 = vpop.f32.mrb[1].mxu1  ;;  %v285_v23 = vadd.f32 %v548_v17, %v418_v16  ;;  %v293_v24 = vadd.f32 %v556_v18, %v418_v16 }
  0xf7   :  { %v549_v21 = vpop.f32.mrb[2].mxu0  ;;  %v557_v22 = vpop.f32.mrb[2].mxu1  ;;  %v283_v29 = vadd.f32 %v418_v16, %v220_v19  ;;  %v291_v30 = vadd.f32 %v418_v16, %v252_v20 }
  0xf8   :  { %v286_v25 = vadd.f32 %v549_v21, %v418_v16  ;;  %v294_v26 = vadd.f32 %v557_v22, %v418_v16  ;;  %v223_v27 = vpop.f32.mrb[3].mxu0  ;;  %v255_v28 = vpop.f32.mrb[3].mxu1 }
  0xf9   :  { %v284_v31 = vadd.f32 %v418_v16, %v223_v27  ;;  %v292_v32 = vadd.f32 %v418_v16, %v255_v28 }
  0xfa   :  { %v475_v33 = vpack.c.bf16 %v286_v25, %v285_v23  ;;  %v495_v34 = vpack.c.bf16 %v294_v26, %v293_v24 }
  0xfb   :  { %v470_v35 = vpack.c.bf16 %v284_v31, %v283_v29  ;;  %v490_v36 = vpack.c.bf16 %v292_v32, %v291_v30 }
  0xfc   :  { %507 = vst [vmem:[%s692_s3 + $0x8] sm:$0xff] %v475_v33   ;;  %511 = vst [vmem:[%s692_s3 + $0x28] sm:$0xff] %v495_v34  }
  0xfd   :  { %471 = vst [vmem:[%s692_s3] sm:$0xff] %v470_v35   ;;  %510 = vst [vmem:[%s692_s3 + $0x20] sm:$0xff] %v490_v36   ;;  %v552_v37 = vpop.f32.mrb[4].mxu0  ;;  %v560_v38 = vpop.f32.mrb[4].mxu1 }
  0xfe   :  { %v236_v39 = vpop.f32.mrb[5].mxu0  ;;  %v268_v40 = vpop.f32.mrb[5].mxu1  ;;  %v289_v43 = vadd.f32 %v552_v37, %v418_v16  ;;  %v297_v44 = vadd.f32 %v560_v38, %v418_v16 }
  0xff   :  { %v553_v41 = vpop.f32.mrb[6].mxu0  ;;  %v561_v42 = vpop.f32.mrb[6].mxu1  ;;  %v287_v49 = vadd.f32 %v418_v16, %v236_v39  ;;  %v295_v50 = vadd.f32 %v418_v16, %v268_v40 }
 0x100   :  { %v290_v45 = vadd.f32 %v553_v41, %v418_v16  ;;  %v298_v46 = vadd.f32 %v561_v42, %v418_v16  ;;  %v239_v47 = vpop.f32.mrb[7].mxu0  ;;  %v271_v48 = vpop.f32.mrb[7].mxu1 }
 0x101   :  { %v288_v51 = vadd.f32 %v418_v16, %v239_v47  ;;  %v296_v52 = vadd.f32 %v418_v16, %v271_v48 }
 0x102   :  { %v485_v53 = vpack.c.bf16 %v290_v45, %v289_v43  ;;  %v505_v54 = vpack.c.bf16 %v298_v46, %v297_v44 }
 0x103   :  { %v480_v55 = vpack.c.bf16 %v288_v51, %v287_v49  ;;  %v500_v56 = vpack.c.bf16 %v296_v52, %v295_v50 }
 0x104   :  { %509 = vst [vmem:[%s692_s3 + $0x18] sm:$0xff] %v485_v53   ;;  %513 = vst [vmem:[%s692_s3 + $0x38] sm:$0xff] %v505_v54  }
 0x105   :  { %508 = vst [vmem:[%s692_s3 + $0x10] sm:$0xff] %v480_v55   ;;  %512 = vst [vmem:[%s692_s3 + $0x30] sm:$0xff] %v500_v56  }

// kernel: basic_block_forward.5
= control target key start
LH: loop header
LB: loop body
LE: loop exit
PB: predicated region body
PF: predicated region fallthrough
CT: control target
= control target key end

     0   :  { %s723_s1 = inlined_call_operand.vmem [shape: bf16[128,128], index: 1, kind: input, shape index: {}]   ;;  %s724_s0 = inlined_call_operand.vmem [shape: bf16[128,128], index: 0, kind: input, shape index: {}]   ;;  %s725_s3 = inlined_call_operand.vmem [shape: bf16[128,128], index: 3, kind: input, shape index: {}]   ;;  %s726_s2 = inlined_call_operand.vmem [shape: f32[1,128], index: 2, kind: input, shape index: {}]   ;;  %s727_s4 = inlined_call_operand.vmem [shape: f32[128,128], index: 4, kind: output, shape index: {}]  }
   0x1   :  { %v541_v0 = vld [vmem:[%s723_s1] sm:$0xff]   ;;  %v542_v1 = vld [vmem:[%s723_s1 + $0x8] sm:$0xff]   ;;  %v543_v2 = vld [vmem:[%s723_s1 + $0x10] sm:$0xff]  }
   0x2   :  { %493 = vmatprep.subr.bf16.mxu0 %v541_v0  ;;  %525 = vmatprep.subr.bf16.mxu1 %v541_v0  ;;  %v544_v3 = vld [vmem:[%s723_s1 + $0x18] sm:$0xff]   ;;  %v549_v4 = vld [vmem:[%s724_s0] sm:$0xff]   ;;  %v546_v7 = vld [vmem:[%s723_s1 + $0x28] sm:$0xff]  }
   0x3   :  { %494 = vmatpush3.bf16.msra.mxu0 %v541_v0  ;;  %533 = vmatpush3.bf16.msra.mxu1 %v541_v0  ;;  %v550_v5 = vld [vmem:[%s724_s0 + $0x20] sm:$0xff]   ;;  %v547_v8 = vld [vmem:[%s723_s1 + $0x30] sm:$0xff]   ;;  %v548_v9 = vld [vmem:[%s723_s1 + $0x38] sm:$0xff]  }
   0x4   :  { %495 = vmatprep.subr.bf16.mxu0 %v542_v1  ;;  %526 = vmatprep.subr.bf16.mxu1 %v542_v1  ;;  %v545_v6 = vld [vmem:[%s723_s1 + $0x20] sm:$0xff]   ;;  %v551_v10 = vld [vmem:[%s724_s0 + $0x8] sm:$0xff]   ;;  %v553_v12 = vld [vmem:[%s724_s0 + $0x10] sm:$0xff]  }
   0x5   :  { %509 = vmatprep.mubr.bf16.mxu0 %v549_v4  ;;  %517 = vmatprep.mubr.bf16.mxu1 %v550_v5  ;;  %v552_v11 = vld [vmem:[%s724_s0 + $0x28] sm:$0xff]   ;;  %v554_v13 = vld [vmem:[%s724_s0 + $0x30] sm:$0xff]   ;;  %v555_v14 = vld [vmem:[%s724_s0 + $0x18] sm:$0xff]  }
   0x6   :  { %v556_v15 = vld [vmem:[%s724_s0 + $0x38] sm:$0xff]   ;;  %v470_v16 = vld [vmem:[%s725_s3 + $0x8] sm:$0xff]   ;;  %v439_v18 = vld [vmem:[%s725_s3] sm:$0xff]  }
   0x7   :  { %496 = vmatpush3.bf16.msra.mxu0 %v542_v1  ;;  %534 = vmatpush3.bf16.msra.mxu1 %v542_v1  ;;  %v474_v17 = vld [vmem:[%s725_s3 + $0x28] sm:$0xff]   ;;  %v473_v19 = vld [vmem:[%s725_s3 + $0x20] sm:$0xff]   ;;  %v444_v21 = vunpack.c.l.bf16 %v470_v16  ;;  %v440_v25 = vunpack.c.l.bf16 %v439_v18  ;;  %v445_v31 = vunpack.c.h.bf16 %v470_v16  ;;  %v441_v37 = vunpack.c.h.bf16 %v439_v18  ;;  %v472_v49 = vld [vmem:[%s725_s3 + $0x18] sm:$0xff]  }
   0x8   :  { %497 = vmatprep.subr.bf16.mxu0 %v543_v2  ;;  %527 = vmatprep.subr.bf16.mxu1 %v543_v2  ;;  %v645_v20 = vld [vmem:[%s726_s2] ss:$0 sm:$0xff]  ;;  %v460_v22 = vunpack.c.l.bf16 %v474_v17  ;;  %v456_v26 = vunpack.c.l.bf16 %v473_v19  ;;  %v461_v32 = vunpack.c.h.bf16 %v474_v17  ;;  %v457_v38 = vunpack.c.h.bf16 %v473_v19  ;;  %v476_v50 = vld [vmem:[%s725_s3 + $0x38] sm:$0xff]   ;;  %v471_v55 = vld [vmem:[%s725_s3 + $0x10] sm:$0xff]  }
   0x9   :  { %v475_v56 = vld [vmem:[%s725_s3 + $0x30] sm:$0xff]   ;;  %v452_v63 = vunpack.c.l.bf16 %v472_v49  ;;  %v468_v0 = vunpack.c.l.bf16 %v476_v50  ;;  %v448_v5 = vunpack.c.l.bf16 %v471_v55  ;;  %v449_v17 = vunpack.c.h.bf16 %v471_v55 }
   0xa   :  { %v465_v18 = vunpack.c.h.bf16 %v475_v56 }
   0xb   :  { %498 = vmatpush3.bf16.msra.mxu0 %v543_v2  ;;  %535 = vmatpush3.bf16.msra.mxu1 %v543_v2 }
   0xc   :  { %499 = vmatprep.subr.bf16.mxu0 %v544_v3  ;;  %528 = vmatprep.subr.bf16.mxu1 %v544_v3 }
   0xf   :  { %500 = vmatpush3.bf16.msra.mxu0 %v544_v3  ;;  %536 = vmatpush3.bf16.msra.mxu1 %v544_v3 }
  0x10   :  { %501 = vmatprep.subr.bf16.mxu0 %v545_v6  ;;  %529 = vmatprep.subr.bf16.mxu1 %v545_v6 }
  0x13   :  { %502 = vmatpush3.bf16.msra.mxu0 %v545_v6  ;;  %537 = vmatpush3.bf16.msra.mxu1 %v545_v6  ;;  %v464_v6 = vunpack.c.l.bf16 %v475_v56 }
  0x14   :  { %503 = vmatprep.subr.bf16.mxu0 %v546_v7  ;;  %530 = vmatprep.subr.bf16.mxu1 %v546_v7 }
  0x17   :  { %504 = vmatpush3.bf16.msra.mxu0 %v546_v7  ;;  %538 = vmatpush3.bf16.msra.mxu1 %v546_v7 }
  0x18   :  { %505 = vmatprep.subr.bf16.mxu0 %v547_v8  ;;  %531 = vmatprep.subr.bf16.mxu1 %v547_v8 }
  0x1b   :  { %506 = vmatpush3.bf16.msra.mxu0 %v547_v8  ;;  %539 = vmatpush3.bf16.msra.mxu1 %v547_v8 }
  0x1c   :  { %507 = vmatprep.subr.bf16.mxu0 %v548_v9  ;;  %532 = vmatprep.subr.bf16.mxu1 %v548_v9 }
  0x1f   :  { %508 = vmatpush3.bf16.msra.mxu0 %v548_v9  ;;  %540 = vmatpush3.bf16.msra.mxu1 %v548_v9 }
  0x22   :  { %510 = vmatmul.mubr.bf16.vlgmr.msra.gmra.mrb[0].mxu0 %v551_v10  ;;  %518 = vmatmul.mubr.bf16.vlgmr.msra.gmra.mrb[0].mxu1 %v552_v11  ;;  %v453_v11 = vunpack.c.h.bf16 %v472_v49 }
  0x23   :  { %513 = vmatprep.mubr.bf16.mxu0 %v553_v12  ;;  %521 = vmatprep.mubr.bf16.mxu1 %v554_v13  ;;  %v469_v12 = vunpack.c.h.bf16 %v476_v50 }
  0x2a   :  { %514 = vmatmul.mubr.bf16.gmra.mrb[4].mxu0 %v555_v14  ;;  %522 = vmatmul.mubr.bf16.gmra.mrb[4].mxu1 %v556_v15 }
  0xf5   :  { %v511_v23 = vpop.f32.mrb[0].mxu0  ;;  %v519_v24 = vpop.f32.mrb[0].mxu1 }
  0xf6   :  { %v288_v27 = vadd.f32 %v511_v23, %v645_v20  ;;  %v296_v28 = vadd.f32 %v519_v24, %v645_v20  ;;  %v223_v29 = vpop.f32.mrb[1].mxu0  ;;  %v255_v30 = vpop.f32.mrb[1].mxu1 }
  0xf7   :  { %v286_v33 = vadd.f32 %v645_v20, %v223_v29  ;;  %v294_v34 = vadd.f32 %v645_v20, %v255_v30  ;;  %v512_v35 = vpop.f32.mrb[2].mxu0  ;;  %v520_v36 = vpop.f32.mrb[2].mxu1 }
  0xf8   :  { %v371_v39 = vadd.f32 %v444_v21, %v288_v27  ;;  %v379_v40 = vadd.f32 %v460_v22, %v296_v28  ;;  %v289_v41 = vadd.f32 %v512_v35, %v645_v20  ;;  %v297_v42 = vadd.f32 %v520_v36, %v645_v20  ;;  %v226_v43 = vpop.f32.mrb[3].mxu0  ;;  %v258_v44 = vpop.f32.mrb[3].mxu1 }
  0xf9   :  { %v369_v45 = vadd.f32 %v440_v25, %v286_v33  ;;  %v377_v46 = vadd.f32 %v456_v26, %v294_v34  ;;  %v287_v47 = vadd.f32 %v645_v20, %v226_v43  ;;  %v295_v48 = vadd.f32 %v645_v20, %v258_v44 }
  0xfa   :  { %v387_v51 = vmax.f32 %v371_v39, 0.0  ;;  %v395_v52 = vmax.f32 %v379_v40, 0.0  ;;  %v372_v53 = vadd.f32 %v445_v31, %v289_v41  ;;  %v380_v54 = vadd.f32 %v461_v32, %v297_v42 }
  0xfb   :  { %v385_v57 = vmax.f32 %v369_v45, 0.0  ;;  %v393_v58 = vmax.f32 %v377_v46, 0.0  ;;  %v370_v59 = vadd.f32 %v441_v37, %v287_v47  ;;  %v378_v60 = vadd.f32 %v457_v38, %v295_v48 }
  0xfc   :  { %403 = vst [vmem:[%s727_s4 + $0x10] sm:$0xff] %v387_v51  ;;  %411 = vst [vmem:[%s727_s4 + $0x50] sm:$0xff] %v395_v52  ;;  %v388_v61 = vmax.f32 %v372_v53, 0.0  ;;  %v396_v62 = vmax.f32 %v380_v54, 0.0 }
  0xfd   :  { %401 = vst [vmem:[%s727_s4] sm:$0xff] %v385_v57  ;;  %409 = vst [vmem:[%s727_s4 + $0x40] sm:$0xff] %v393_v58  ;;  %v386_v1 = vmax.f32 %v370_v59, 0.0  ;;  %v394_v2 = vmax.f32 %v378_v60, 0.0  ;;  %v515_v3 = vpop.f32.mrb[4].mxu0  ;;  %v523_v4 = vpop.f32.mrb[4].mxu1 }
  0xfe   :  { %404 = vst [vmem:[%s727_s4 + $0x18] sm:$0xff] %v388_v61  ;;  %412 = vst [vmem:[%s727_s4 + $0x58] sm:$0xff] %v396_v62  ;;  %v292_v7 = vadd.f32 %v515_v3, %v645_v20  ;;  %v300_v8 = vadd.f32 %v523_v4, %v645_v20  ;;  %v239_v9 = vpop.f32.mrb[5].mxu0  ;;  %v271_v10 = vpop.f32.mrb[5].mxu1 }
  0xff   :  { %402 = vst [vmem:[%s727_s4 + $0x8] sm:$0xff] %v386_v1  ;;  %410 = vst [vmem:[%s727_s4 + $0x48] sm:$0xff] %v394_v2  ;;  %v290_v13 = vadd.f32 %v645_v20, %v239_v9  ;;  %v298_v14 = vadd.f32 %v645_v20, %v271_v10  ;;  %v516_v15 = vpop.f32.mrb[6].mxu0  ;;  %v524_v16 = vpop.f32.mrb[6].mxu1 }
 0x100   :  { %v375_v19 = vadd.f32 %v452_v63, %v292_v7  ;;  %v383_v21 = vadd.f32 %v468_v0, %v300_v8  ;;  %v293_v22 = vadd.f32 %v516_v15, %v645_v20  ;;  %v301_v23 = vadd.f32 %v524_v16, %v645_v20  ;;  %v242_v24 = vpop.f32.mrb[7].mxu0  ;;  %v274_v25 = vpop.f32.mrb[7].mxu1 }
 0x101   :  { %v373_v26 = vadd.f32 %v448_v5, %v290_v13  ;;  %v381_v27 = vadd.f32 %v464_v6, %v298_v14  ;;  %v291_v28 = vadd.f32 %v645_v20, %v242_v24  ;;  %v299_v29 = vadd.f32 %v645_v20, %v274_v25 }
 0x102   :  { %v391_v30 = vmax.f32 %v375_v19, 0.0  ;;  %v399_v31 = vmax.f32 %v383_v21, 0.0  ;;  %v376_v32 = vadd.f32 %v453_v11, %v293_v22  ;;  %v384_v33 = vadd.f32 %v469_v12, %v301_v23 }
 0x103   :  { %v389_v34 = vmax.f32 %v373_v26, 0.0  ;;  %v397_v35 = vmax.f32 %v381_v27, 0.0  ;;  %v374_v36 = vadd.f32 %v449_v17, %v291_v28  ;;  %v382_v37 = vadd.f32 %v465_v18, %v299_v29 }
 0x104   :  { %407 = vst [vmem:[%s727_s4 + $0x30] sm:$0xff] %v391_v30  ;;  %415 = vst [vmem:[%s727_s4 + $0x70] sm:$0xff] %v399_v31  ;;  %v392_v38 = vmax.f32 %v376_v32, 0.0  ;;  %v400_v39 = vmax.f32 %v384_v33, 0.0 }
 0x105   :  { %405 = vst [vmem:[%s727_s4 + $0x20] sm:$0xff] %v389_v34  ;;  %413 = vst [vmem:[%s727_s4 + $0x60] sm:$0xff] %v397_v35  ;;  %v390_v20 = vmax.f32 %v374_v36, 0.0  ;;  %v398_v40 = vmax.f32 %v382_v37, 0.0 }
 0x106   :  { %408 = vst [vmem:[%s727_s4 + $0x38] sm:$0xff] %v392_v38  ;;  %416 = vst [vmem:[%s727_s4 + $0x78] sm:$0xff] %v400_v39 }
 0x107   :  { %406 = vst [vmem:[%s727_s4 + $0x28] sm:$0xff] %v390_v20  ;;  %414 = vst [vmem:[%s727_s4 + $0x68] sm:$0xff] %v398_v40 }

</bundles_post_ra>
